<compile_context>
chip_gen: v6e
topology: v6e:2x2x1
jax: 0.10.0
libtpu: 0.0.40
codegen_flags: <defaults>
</compile_context>

<pallas_src>
import functools

import jax
import jax.numpy as jnp
from jax import lax
from jax.experimental import pallas as pl
from jax.experimental.pallas import tpu as pltpu

_LANES = 128
_NEG_FILL = -1.0e30                    # sigmoid(_NEG_FILL) == 0.0 exactly in f32
_TARGET_STEP_BYTES = 2 * 1024 * 1024   # ~2 MiB per input per grid step
_SMOOTH = 1e-05


def _round_down(x, m):
    return (x // m) * m


def _make_dice_partials_kernel(BB, tiles_per_chunk, tile_rows, rows_per_chunk,
                               total_rows, ragged, unroll):
    """Builds the streaming dice-partials kernel for one (batch-group, chunk) step.

    x_ref, t_ref : (BB, rows_per_chunk, 128) VMEM tiles (input dtypes pass through)
    acc_ref      : (BB, 4, tile_rows, 128) resident accumulator; per batch row:
        0: sum(score * t)          1: sum(score^2 + t^2)
        2: sum(out * gt)           3: sum(out + gt)
    """

    def kernel(x_ref, t_ref, acc_ref):
        c = pl.program_id(1)

        @pl.when(c == 0)
        def _():
            acc_ref[...] = jnp.zeros_like(acc_ref)

        if ragged:
            # Row index of each sublane within the array; rows >= total_rows are
            # Pallas edge-block garbage and are masked out before any math.
            sub_iota = lax.broadcasted_iota(jnp.int32, (tile_rows, _LANES), 0)
            chunk_row0 = c * rows_per_chunk

        zero = jnp.zeros((tile_rows, _LANES), jnp.float32)

        for b in range(BB):                       # BB is small & static
            def tile_body(i, carry):
                a0, a1, a2, a3 = carry
                r0 = pl.multiple_of(i * tile_rows, tile_rows)
                x = x_ref[b, pl.ds(r0, tile_rows), :].astype(jnp.float32)
                t = t_ref[b, pl.ds(r0, tile_rows), :].astype(jnp.float32)
                if ragged:
                    valid = (chunk_row0 + r0 + sub_iota) < total_rows
                    x = jnp.where(valid, x, _NEG_FILL)
                    t = jnp.where(valid, t, 0.0)
                score = jax.nn.sigmoid(x)                   # torch.sigmoid(inputs)
                out = (x > 0.0).astype(jnp.float32)         # == (sigmoid(x) > 0.5)
                gt = (t > 0.5).astype(jnp.float32)
                a0 = a0 + score * t
                a1 = a1 + score * score + t * t
                a2 = a2 + out * gt
                a3 = a3 + out + gt
                return a0, a1, a2, a3

            a0, a1, a2, a3 = lax.fori_loop(
                0, tiles_per_chunk, tile_body, (zero, zero, zero, zero),
                unroll=unroll)
            acc_ref[b, 0] += a0
            acc_ref[b, 1] += a1
            acc_ref[b, 2] += a2
            acc_ref[b, 3] += a3

    return kernel


@functools.partial(jax.jit, static_argnames=("softmax",))
def dice_loss(inputs, target, weight=None, softmax=False):
    """JAX/Pallas DiceLoss.forward -> (loss, dice_metric.sum(), num_zero_metric)."""
    assert inputs.shape == target.shape, (
        "predict {} & target {} shape do not match".format(inputs.shape, target.shape))
    del weight  # the reference forward() never uses it
    if softmax:
        # TODO(synk): fuse the dim=1 softmax into the kernel to avoid one extra
        # HBM read+write pass on the softmax=True path.
        inputs = jax.nn.softmax(inputs, axis=1)

    B, H, W = inputs.shape
    N = H * W

    # ---- lane-dense layout: (B, H, W) -> (B, R, 128); no full-array pad pass ----
    R = pl.cdiv(N, _LANES)
    x = inputs.reshape(B, N)
    t = target.reshape(B, N)
    if R * _LANES != N:
        # Only when H*W is not a multiple of 128 (rare for image shapes).
        # Padded logits are very negative -> sigmoid == 0, targets 0, so padded
        # elements contribute exactly 0 to every partial sum.
        pad = R * _LANES - N
        x = jnp.pad(x, ((0, 0), (0, pad)), constant_values=_NEG_FILL)
        t = jnp.pad(t, ((0, 0), (0, pad)), constant_values=0)
    x = x.reshape(B, R, _LANES)
    t = t.reshape(B, R, _LANES)

    # ---- pick tile / chunk / batch-group sizes ----
    itembytes = max(x.dtype.itemsize, t.dtype.itemsize)
    if R < 8:
        tile_rows = R                              # full-extent block (legal)
        max_rpc = R
    else:
        if x.dtype.itemsize <= 2 and R % 16 == 0:
            tile_rows = 16                         # bf16 native sublane packing
        else:
            tile_rows = 8
        max_rpc = _round_down(R, tile_rows)

    target_rows = max(tile_rows, _TARGET_STEP_BYTES // (_LANES * itembytes))
    min_parallel = 2 if B >= 2 else 1              # keep >=2 parallel steps (v7x 2 TCs)

    if R >= target_rows:
        BB = 1
        rows_per_chunk = min(max_rpc, _round_down(target_rows, tile_rows))
    else:
        # One batch row is below the per-step payload target: pack batch rows
        # into the block while keeping a multi-step parallel axis when B >= 2.
        want = max(1, target_rows // max(R, 1))
        bb_cap = max(1, B // min_parallel)
        BB = 1
        for cand in range(1, min(want, bb_cap) + 1):
            if B % cand == 0:
                BB = cand
        rows_per_chunk = max_rpc

    nc = pl.cdiv(R, rows_per_chunk)
    tiles_per_chunk = rows_per_chunk // tile_rows
    ragged = (nc * rows_per_chunk != R)            # last chunk overhangs -> in-kernel mask
    unroll = min(8, tiles_per_chunk)
    grid = (B // BB, nc)

    kernel = _make_dice_partials_kernel(BB, tiles_per_chunk, tile_rows,
                                        rows_per_chunk, R, ragged, unroll)

    in_block = (BB, rows_per_chunk, _LANES)
    out_block = (BB, 4, tile_rows, _LANES)
    partials = pl.pallas_call(
        kernel,
        out_shape=jax.ShapeDtypeStruct((B, 4, tile_rows, _LANES), jnp.float32),
        grid_spec=pltpu.PrefetchScalarGridSpec(
            num_scalar_prefetch=0,
            grid=grid,
            in_specs=[
                pl.BlockSpec(in_block, lambda g, c: (g, c, 0)),
                pl.BlockSpec(in_block, lambda g, c: (g, c, 0)),
            ],
            # Output block resident across the chunk axis -> accumulator.
            out_specs=pl.BlockSpec(out_block, lambda g, c: (g, 0, 0, 0)),
        ),
        compiler_params=pltpu.CompilerParams(
            dimension_semantics=("parallel", "arbitrary"),
            vmem_limit_bytes=32 * 1024 * 1024),
    )(x, t)

    # ---- tiny glue reduction (O(B*4*tile_rows*128)) + scalar dice arithmetic ----
    sums = jnp.sum(partials, axis=(2, 3))          # (B, 4)
    intersect = jnp.sum(sums[:, 0])
    yz_sum = jnp.sum(sums[:, 1])                   # z_sum + y_sum (merged)
    dice = (2.0 * intersect + _SMOOTH) / (yz_sum + _SMOOTH)
    loss = 1.0 - dice

    inter = sums[:, 2]                             # per-batch hard intersection
    uni = sums[:, 3]                               # out.sum(1,2) + gt.sum(1,2)
    dice_metric = 2.0 * inter / (uni + _SMOOTH)    # (B,)
    # PyTorch returns int64 here; JAX default is int32 (values identical).
    num_zero_metric = dice_metric.shape[0] - jnp.count_nonzero(dice_metric)

    return loss, jnp.sum(dice_metric), num_zero_metric


def _dice_loss_reference(inputs, target, softmax=False):
    """Pure-JAX mirror of the PyTorch module, for correctness checks."""
    if softmax:
        inputs = jax.nn.softmax(inputs, axis=1)
    score = jax.nn.sigmoid(inputs.astype(jnp.float32))
    t = target.astype(jnp.float32)
    intersect = jnp.sum(score * t)
    y_sum = jnp.sum(t * t)
    z_sum = jnp.sum(score * score)
    loss = 1.0 - (2.0 * intersect + _SMOOTH) / (z_sum + y_sum + _SMOOTH)
    out = (score > 0.5).astype(jnp.float32)
    gt = (t > 0.5).astype(jnp.float32)
    inter = jnp.sum(out * gt, axis=(1, 2))
    uni = jnp.sum(out, axis=(1, 2)) + jnp.sum(gt, axis=(1, 2))
    dice_metric = 2.0 * inter / (uni + _SMOOTH)
    num_zero = dice_metric.shape[0] - jnp.count_nonzero(dice_metric)
    return loss, jnp.sum(dice_metric), num_zero


def _check(name, got, want, tol=1e-3):
    g_loss, g_dms, g_nzm = got
    w_loss, w_dms, w_nzm = want
    assert abs(float(g_loss) - float(w_loss)) < tol, (name, float(g_loss), float(w_loss))
    assert abs(float(g_dms) - float(w_dms)) < tol, (name, float(g_dms), float(w_dms))
    assert int(g_nzm) == int(w_nzm), (name, int(g_nzm), int(w_nzm))


if __name__ == "__main__":
    key = jax.random.PRNGKey(0)
    k1, k2 = jax.random.split(key)

    # Primary example: DiceLoss(n_classes=4).forward on (B, H, W) logits/mask.
    B, H, W = 2, 16, 16
    inputs = jax.random.normal(k1, (B, H, W), dtype=jnp.float32)            # raw logits
    target = (jax.random.uniform(k2, (B, H, W)) > 0.5).astype(jnp.float32)  # binary mask

    result = dice_loss(inputs, target)
    jax.block_until_ready(result)
    _check("base", result, _dice_loss_reference(inputs, target))

    # softmax=True path (softmax over dim=1, as in the PyTorch forward).
    _check("softmax", dice_loss(inputs, target, softmax=True),
           _dice_loss_reference(inputs, target, softmax=True))

    # Ragged-chunk path: R=10 rows of 128 lanes, last block overhangs R and is
    # masked in-kernel (no jnp.pad of the full tensors).
    k3, k4 = jax.random.split(k1)
    xr = jax.random.normal(k3, (2, 40, 32), dtype=jnp.float32)
    tr = (jax.random.uniform(k4, (2, 40, 32)) > 0.5).astype(jnp.float32)
    _check("ragged", dice_loss(xr, tr), _dice_loss_reference(xr, tr))

    # Batch-packing path (BB>1) with narrow dtypes passed straight through.
    k5, k6 = jax.random.split(k2)
    xb = jax.random.normal(k5, (4, 16, 16), dtype=jnp.bfloat16)
    tb = (jax.random.uniform(k6, (4, 16, 16)) > 0.5).astype(jnp.uint8)
    _check("bf16/u8", dice_loss(xb, tb), _dice_loss_reference(xb, tb), tol=5e-3)

    print("KERNEL_OK")
</pallas_src>

<mosaic_0001>
module attributes {stable_mosaic.version = 11 : i64} {
  func.func @kernel(%arg0: i32, %arg1: i32, %arg2: memref<1x2x128xf32, #tpu.memory_space<vmem>>, %arg3: memref<1x2x128xf32, #tpu.memory_space<vmem>>, %arg4: memref<1x4x2x128xf32, #tpu.memory_space<vmem>>) attributes {dimension_semantics = [#tpu.dimension_semantics<parallel>, #tpu.dimension_semantics<arbitrary>], iteration_bounds = array<i64: 2, 1>, scalar_prefetch = 0 : i64, scratch_operands = 0 : i64, tpu.core_type = #tpu.core_type<tc>, window_params = [{transform_indices = @transform_0, window_bounds = array<i64: 1, 2, 128>}, {transform_indices = @transform_1, window_bounds = array<i64: 1, 2, 128>}, {transform_indices = @transform_2, window_bounds = array<i64: 1, 4, 2, 128>}]} {
    %c0_i32 = arith.constant 0 : i32
    %0 = arith.cmpi eq, %arg1, %c0_i32 : i32
    %1 = arith.extui %0 : i1 to i32
    %c0_i32_0 = arith.constant 0 : i32
    %2 = arith.cmpi ne, %1, %c0_i32_0 : i32
    scf.if %2 {
      %cst_37 = arith.constant 0.000000e+00 : f32
      %59 = vector.broadcast %cst_37 : f32 to vector<1x4x2x128xf32>
      %c0_38 = arith.constant 0 : index
      %c0_39 = arith.constant 0 : index
      %c0_40 = arith.constant 0 : index
      %c0_41 = arith.constant 0 : index
      %60 = vector.load %arg4[%c0_38, %c0_39, %c0_40, %c0_41] : memref<1x4x2x128xf32, #tpu.memory_space<vmem>>, vector<1x4x2x128xf32>
      tpu.vector_store %arg4[%c0_38, %c0_39, %c0_40, %c0_41], %59 {strides = array<i32>} : memref<1x4x2x128xf32, #tpu.memory_space<vmem>>, vector<1x4x2x128xf32>,
    } else {
    }
    %cst = arith.constant 0.000000e+00 : f32
    %3 = vector.broadcast %cst : f32 to vector<2x128xf32>
    %c0_i32_1 = arith.constant 0 : i32
    %c2_i32 = arith.constant 2 : i32
    %4 = arith.muli %c0_i32_1, %c2_i32 : i32
    %5 = tpu.assume_multiple %4, 2 : i32
    %c0 = arith.constant 0 : index
    %6 = arith.index_cast %5 : i32 to index
    %c0_2 = arith.constant 0 : index
    %7 = vector.load %arg2[%c0, %6, %c0_2] : memref<1x2x128xf32, #tpu.memory_space<vmem>>, vector<1x2x128xf32>
    %8 = vector.shape_cast %7 : vector<1x2x128xf32> to vector<2x128xf32>
    %c0_3 = arith.constant 0 : index
    %9 = arith.index_cast %5 : i32 to index
    %c0_4 = arith.constant 0 : index
    %10 = vector.load %arg3[%c0_3, %9, %c0_4] : memref<1x2x128xf32, #tpu.memory_space<vmem>>, vector<1x2x128xf32>
    %11 = vector.shape_cast %10 : vector<1x2x128xf32> to vector<2x128xf32>
    %12 = arith.negf %8 : vector<2x128xf32>
    %13 = math.exp %12 : vector<2x128xf32>
    %cst_5 = arith.constant 1.000000e+00 : f32
    %14 = vector.broadcast %cst_5 : f32 to vector<2x128xf32>
    %15 = arith.addf %14, %13 : vector<2x128xf32>
    %16 = arith.divf %14, %15 : vector<2x128xf32>
    %cst_6 = arith.constant 0.000000e+00 : f32
    %17 = vector.broadcast %cst_6 : f32 to vector<2x128xf32>
    %18 = arith.cmpf ogt, %8, %17 : vector<2x128xf32>
    %19 = arith.extui %18 : vector<2x128xi1> to vector<2x128xi32>
    %20 = arith.sitofp %19 : vector<2x128xi32> to vector<2x128xf32>
    %cst_7 = arith.constant 5.000000e-01 : f32
    %21 = vector.broadcast %cst_7 : f32 to vector<2x128xf32>
    %22 = arith.cmpf ogt, %11, %21 : vector<2x128xf32>
    %23 = arith.extui %22 : vector<2x128xi1> to vector<2x128xi32>
    %24 = arith.sitofp %23 : vector<2x128xi32> to vector<2x128xf32>
    %25 = arith.mulf %16, %11 : vector<2x128xf32>
    %26 = arith.addf %3, %25 : vector<2x128xf32>
    %27 = arith.mulf %16, %16 : vector<2x128xf32>
    %28 = arith.addf %3, %27 : vector<2x128xf32>
    %29 = arith.mulf %11, %11 : vector<2x128xf32>
    %30 = arith.addf %28, %29 : vector<2x128xf32>
    %31 = arith.mulf %20, %24 : vector<2x128xf32>
    %32 = arith.addf %3, %31 : vector<2x128xf32>
    %33 = arith.addf %3, %20 : vector<2x128xf32>
    %34 = arith.addf %33, %24 : vector<2x128xf32>
    %c1_i32 = arith.constant 1 : i32
    %c0_8 = arith.constant 0 : index
    %c0_9 = arith.constant 0 : index
    %c0_10 = arith.constant 0 : index
    %c0_11 = arith.constant 0 : index
    %35 = vector.load %arg4[%c0_8, %c0_9, %c0_10, %c0_11] : memref<1x4x2x128xf32, #tpu.memory_space<vmem>>, vector<1x1x2x128xf32>
    %36 = vector.shape_cast %35 : vector<1x1x2x128xf32> to vector<2x128xf32>
    %37 = arith.addf %36, %26 : vector<2x128xf32>
    %c0_12 = arith.constant 0 : index
    %c0_13 = arith.constant 0 : index
    %c0_14 = arith.constant 0 : index
    %c0_15 = arith.constant 0 : index
    %38 = vector.load %arg4[%c0_12, %c0_13, %c0_14, %c0_15] : memref<1x4x2x128xf32, #tpu.memory_space<vmem>>, vector<1x1x2x128xf32>
    %39 = vector.shape_cast %38 : vector<1x1x2x128xf32> to vector<2x128xf32>
    %40 = vector.shape_cast %37 : vector<2x128xf32> to vector<1x1x2x128xf32>
    tpu.vector_store %arg4[%c0_12, %c0_13, %c0_14, %c0_15], %40 {strides = array<i32>} : memref<1x4x2x128xf32, #tpu.memory_space<vmem>>, vector<1x1x2x128xf32>,
    %c0_16 = arith.constant 0 : index
    %c1 = arith.constant 1 : index
    %c0_17 = arith.constant 0 : index
    %c0_18 = arith.constant 0 : index
    %41 = vector.load %arg4[%c0_16, %c1, %c0_17, %c0_18] : memref<1x4x2x128xf32, #tpu.memory_space<vmem>>, vector<1x1x2x128xf32>
    %42 = vector.shape_cast %41 : vector<1x1x2x128xf32> to vector<2x128xf32>
    %43 = arith.addf %42, %30 : vector<2x128xf32>
    %c0_19 = arith.constant 0 : index
    %c1_20 = arith.constant 1 : index
    %c0_21 = arith.constant 0 : index
    %c0_22 = arith.constant 0 : index
    %44 = vector.load %arg4[%c0_19, %c1_20, %c0_21, %c0_22] : memref<1x4x2x128xf32, #tpu.memory_space<vmem>>, vector<1x1x2x128xf32>
    %45 = vector.shape_cast %44 : vector<1x1x2x128xf32> to vector<2x128xf32>
    %46 = vector.shape_cast %43 : vector<2x128xf32> to vector<1x1x2x128xf32>
    tpu.vector_store %arg4[%c0_19, %c1_20, %c0_21, %c0_22], %46 {strides = array<i32>} : memref<1x4x2x128xf32, #tpu.memory_space<vmem>>, vector<1x1x2x128xf32>,
    %c0_23 = arith.constant 0 : index
    %c2 = arith.constant 2 : index
    %c0_24 = arith.constant 0 : index
    %c0_25 = arith.constant 0 : index
    %47 = vector.load %arg4[%c0_23, %c2, %c0_24, %c0_25] : memref<1x4x2x128xf32, #tpu.memory_space<vmem>>, vector<1x1x2x128xf32>
    %48 = vector.shape_cast %47 : vector<1x1x2x128xf32> to vector<2x128xf32>
    %49 = arith.addf %48, %32 : vector<2x128xf32>
    %c0_26 = arith.constant 0 : index
    %c2_27 = arith.constant 2 : index
    %c0_28 = arith.constant 0 : index
    %c0_29 = arith.constant 0 : index
    %50 = vector.load %arg4[%c0_26, %c2_27, %c0_28, %c0_29] : memref<1x4x2x128xf32, #tpu.memory_space<vmem>>, vector<1x1x2x128xf32>
    %51 = vector.shape_cast %50 : vector<1x1x2x128xf32> to vector<2x128xf32>
    %52 = vector.shape_cast %49 : vector<2x128xf32> to vector<1x1x2x128xf32>
    tpu.vector_store %arg4[%c0_26, %c2_27, %c0_28, %c0_29], %52 {strides = array<i32>} : memref<1x4x2x128xf32, #tpu.memory_space<vmem>>, vector<1x1x2x128xf32>,
    %c0_30 = arith.constant 0 : index
    %c3 = arith.constant 3 : index
    %c0_31 = arith.constant 0 : index
    %c0_32 = arith.constant 0 : index
    %53 = vector.load %arg4[%c0_30, %c3, %c0_31, %c0_32] : memref<1x4x2x128xf32, #tpu.memory_space<vmem>>, vector<1x1x2x128xf32>
    %54 = vector.shape_cast %53 : vector<1x1x2x128xf32> to vector<2x128xf32>
    %55 = arith.addf %54, %34 : vector<2x128xf32>
    %c0_33 = arith.constant 0 : index
    %c3_34 = arith.constant 3 : index
    %c0_35 = arith.constant 0 : index
    %c0_36 = arith.constant 0 : index
    %56 = vector.load %arg4[%c0_33, %c3_34, %c0_35, %c0_36] : memref<1x4x2x128xf32, #tpu.memory_space<vmem>>, vector<1x1x2x128xf32>
    %57 = vector.shape_cast %56 : vector<1x1x2x128xf32> to vector<2x128xf32>
    %58 = vector.shape_cast %55 : vector<2x128xf32> to vector<1x1x2x128xf32>
    tpu.vector_store %arg4[%c0_33, %c3_34, %c0_35, %c0_36], %58 {strides = array<i32>} : memref<1x4x2x128xf32, #tpu.memory_space<vmem>>, vector<1x1x2x128xf32>,
    return
  }
  func.func @transform_0(%arg0: i32, %arg1: i32) -> (i32, i32, i32) {
    %c0_i32 = arith.constant 0 : i32
    %c0_i32_0 = arith.constant 0 : i32
    return %arg0, %arg1, %c0_i32 : i32, i32, i32
  }
  func.func @transform_1(%arg0: i32, %arg1: i32) -> (i32, i32, i32) {
    %c0_i32 = arith.constant 0 : i32
    %c0_i32_0 = arith.constant 0 : i32
    return %arg0, %arg1, %c0_i32 : i32, i32, i32
  }
  func.func @transform_2(%arg0: i32, %arg1: i32) -> (i32, i32, i32, i32) {
    %c0_i32 = arith.constant 0 : i32
    %c0_i32_0 = arith.constant 0 : i32
    %c0_i32_1 = arith.constant 0 : i32
    %c0_i32_2 = arith.constant 0 : i32
    return %arg0, %c0_i32, %c0_i32_0, %c0_i32_1 : i32, i32, i32, i32
  }
}

</mosaic_0001>

<bundles_post_ra>
// kernel: dice_loss.1
= control target key start
LH: loop header
LB: loop body
LE: loop exit
PB: predicated region body
PF: predicated region fallthrough
CT: control target
= control target key end

     0   :  { %s410_s9 = smov 0   ;;  %s412_s10 = smov 0   ;;  %s460_s0 = inlined_call_operand.vmem [shape: f32[2,2,128], index: 0, kind: input, shape index: {}]   ;;  %s461_s1 = inlined_call_operand.vmem [shape: f32[2,2,128], index: 1, kind: input, shape index: {}]   ;;  %s462_s2 = inlined_call_operand.vmem [shape: f32[2,4,2,128], index: 2, kind: output, shape index: {}]  }
   0x1   :  { %s414_s11 = smov 0  }
   0x2 LB: > { %s24_s12 = sadd.s32 1, %s388_s10  ;;  %p324_p0 = scmp.ge.s32.totalorder %s392_s11, 1  ;;  %s392_s11 = sphi %s414_s11, %s12_s11   ;;  %s388_s10 = sphi %s412_s10, %s464_s10   ;;  %s384_s9 = sphi %s410_s9, %s463_s9  }
   0x3   : > { %p26_p1 = scmp.ge.s32.totalorder %s24_s12, 2  ;;  %p142_p2 = scmp.lt.s32.totalorder %s392_s11, 3 }
   0x5   : > { %s466_s12 = smov (%p26_p1, %s24_s12), 0  ;;  %p143_p3 = pnand %p324_p0, %p142_p2 }
   0x6   : > { %p173_p4 = scmp.lt.s32.totalorder (!%p143_p3), %s384_s9, 1 }
   0x7   : > { %146 = sbr.rel (%p143_p3) target bundleno = 56 (0x38), region = 28 }
   0xc   : > { %s468_s9 = smov (!%p173_p4, %s384_s9), 1  ;;  %v394_v0 = vmov 0.0  }
   0xd   : > { %s340_s13 = sshll.u32 %s468_s9, 3  ;;  %s325_s14 = sshll.u32 %s468_s9, 1 }
   0xe   : > { %s431_s17 = scalar_lea.vmem %s462_s2, %s340_s13  ;;  %s179_s20 = scalar_lea.vmem %s460_s0, %s325_s14 }
   0xf   : > { %196 = vst [vmem:[%s431_s17] sm:$0x3] %v394_v0  ;;  %197 = vst [vmem:[%s431_s17 + $0x2] sm:$0x3] %v394_v0  ;;  %s186_s23 = scalar_lea.vmem %s461_s1, %s325_s14  ;;  %v200_v1 = vld [vmem:[%s179_s20] sm:$0x3] }
  0x10   : > { %198 = vst [vmem:[%s431_s17 + $0x4] sm:$0x3] %v394_v0  ;;  %199 = vst [vmem:[%s431_s17 + $0x6] sm:$0x3] %v394_v0  ;;  %v201_v2 = vld [vmem:[%s186_s23] sm:$0x3] }
  0x11   : > { %v329_v3 = vmul.f32 -1.442695, %v200_v1  ;;  %vm208_vm0 = vcmp.gt.f32.partialorder %v200_v1, 0.0  ;;  %vm211_vm1 = vcmp.gt.f32.partialorder %v201_v2, 0.5  ;;  %v218_v14 = vmul.f32 %v201_v2, %v201_v2 }
  0x12   : > { %v330_v4 = vsel %vm208_vm0, 1.0, %v394_v0  ;;  %v331_v5 = vsel %vm211_vm1, 1.0, %v394_v0 }
  0x13   : > { %366 = vpow2.f32 %v329_v3  ;;  %v220_v6 = vmul.f32 %v331_v5, %v330_v4  ;;  %v223_v7 = vadd.f32 %v331_v5, %v330_v4 }
  0x16   : > { %v224_v16 = vld [vmem:[%s431_s17] sm:$0x3]  ;;  %v332_v19 = vld [vmem:[%s431_s17 + $0x2] sm:$0x3] }
  0x17   : > { %v334_v8 = vld [vmem:[%s431_s17 + $0x4] sm:$0x3]  ;;  %v336_v10 = vld [vmem:[%s431_s17 + $0x6] sm:$0x3] }
  0x18   : > { %v233_v9 = vadd.f32 %v334_v8, %v220_v6  ;;  %v237_v11 = vadd.f32 %v336_v10, %v223_v7 }
  0x1a   : > { %335 = vst [vmem:[%s431_s17 + $0x4] sm:$0x3] %v233_v9  ;;  %337 = vst [vmem:[%s431_s17 + $0x6] sm:$0x3] %v237_v11 }
  0x20   : > { %v367_v12 = vpop.eup %366 }
  0x21   : > { %v205_v13 = vadd.f32 1.0, %v367_v12 }
  0x23   : > { %368 = vrcp.f32 %v205_v13 }
  0x30   : > { %v369_v15 = vpop.eup %368 }
  0x31   : > { %v214_v17 = vmul.f32 %v369_v15, %v201_v2  ;;  %v216_v18 = vmul.f32 %v369_v15, %v369_v15 }
  0x33   : > { %v225_v20 = vadd.f32 %v224_v16, %v214_v17  ;;  %v219_v21 = vadd.f32 %v218_v14, %v216_v18 }
  0x35   : > { %226 = vst [vmem:[%s431_s17] sm:$0x3] %v225_v20  ;;  %v229_v22 = vadd.f32 %v332_v19, %v219_v21 }
  0x37   : > { %333 = vst [vmem:[%s431_s17 + $0x2] sm:$0x3] %v229_v22 }
  0x38 PF: > { %s12_s11 = sadd.s32 1, %s392_s11   ;;  %s463_s9 = smov %s388_s10 }
  0x39   : > { %p9_p5 = scmp.ge.s32.totalorder %s12_s11, 4   ;;  %s464_s10 = smov %s466_s12 }
  0x3b   :  { %11 = sbr.rel (!%p9_p5) target bundleno = 2 (0x2), region = 68 }

</bundles_post_ra>
